<compile_context>
chip_gen: v5e
topology: v5e:2x2
jax: 0.10.0
libtpu: 0.0.40
codegen_flags: <defaults>
</compile_context>

<pallas_src>
import functools

import jax
import jax.numpy as jnp
from jax.experimental import pallas as pl
from jax.experimental.pallas import tpu as pltpu


def _round_up(x: int, m: int) -> int:
    return ((x + m - 1) // m) * m


# ---------------------------------------------------------------------------
# Kernels
# ---------------------------------------------------------------------------
def _gcn_rowslab_kernel(adj_ref, h_ref, b_ref, out_ref):
    """adj_ref: (TM, N_pad) caller dtype (cast to bf16 here); h_ref: (N_pad,
    F_out_pad) bf16 resident; b_ref: (1, F_out_pad) f32; out_ref: (TM, F_out_pad)."""
    agg = jnp.dot(adj_ref[...].astype(jnp.bfloat16), h_ref[...],
                  preferred_element_type=jnp.float32)
    out_ref[...] = jnp.maximum(agg + b_ref[...], 0.0).astype(out_ref.dtype)


def _gcn_ktile_kernel(adj_ref, h_ref, b_ref, out_ref, acc_ref):
    k = pl.program_id(1)

    @pl.when(k == 0)
    def _():
        acc_ref[...] = jnp.zeros_like(acc_ref)

    acc_ref[...] += jnp.dot(adj_ref[...].astype(jnp.bfloat16), h_ref[...],
                            preferred_element_type=jnp.float32)

    @pl.when(k == pl.num_programs(1) - 1)
    def _():
        out_ref[...] = jnp.maximum(acc_ref[...] + b_ref[...],
                                   0.0).astype(out_ref.dtype)


# ---------------------------------------------------------------------------
# Wrapper
# ---------------------------------------------------------------------------
@functools.partial(jax.jit, static_argnames=("tile_n", "force_ktile"))
def gcn_update(features, adj, weight, bias, *, tile_n: int = 512,
               force_ktile: bool = False):
    """relu(adj @ features @ weight.T + bias).

    features: [N, F_in], adj: [N, N], weight: [F_out, F_in] (torch layout),
    bias: [F_out].  Returns [N, F_out] in features.dtype.
    """
    n, f_in = features.shape
    f_out = weight.shape[0]
    out_dtype = features.dtype
    f_out_pad = _round_up(f_out, 128)

    adj_bytes = jnp.dtype(adj.dtype).itemsize
    out_bytes = jnp.dtype(out_dtype).itemsize

    # Matmul reorder: H = X @ W^T at f32 (tiny); kernel then only streams adj.
    h = jnp.dot(features.astype(jnp.float32), weight.astype(jnp.float32).T)

    # ---- tile / path selection (all static under jit) ----------------------
    tm_a = min(tile_n, _round_up(n, 8))
    if tm_a >= n and n > 256:
        # Single row tile would cover all rows: halve it so the parallel row
        # axis has 2 steps (v7x megacore keeps both TensorCores busy).
        tm_a = _round_up(-(-n // 2), 8)
    n_pad_a = _round_up(n, tm_a)
    rowslab_vmem = (2 * tm_a * n_pad_a * adj_bytes          # adj double buffer
                    + 2 * n_pad_a * f_out_pad * 2           # resident bf16 H
                    + 2 * tm_a * f_out_pad * out_bytes      # out double buffer
                    + 2 * f_out_pad * 4)                    # bias
    use_rowslab = (not force_ktile) and rowslab_vmem <= 24 * 1024 * 1024

    if use_rowslab:
        tm, n_pad = tm_a, n_pad_a
        est_vmem = rowslab_vmem
    else:
        # K-tiled fallback for large N: square, multiple-of-128 tiles.
        tm = max(128, _round_up(min(tile_n, _round_up(n, 128)), 128))
        n_pad = _round_up(n, tm)
        est_vmem = (2 * tm * tm * adj_bytes
                    + 2 * tm * f_out_pad * 2
                    + 2 * tm * f_out_pad * out_bytes
                    + tm * f_out_pad * 4                    # f32 accumulator
                    + 2 * f_out_pad * 4)

    # ---- operand prep (only the big adj copy is conditional) ---------------
    if n_pad != n:
        adj_in = jnp.zeros((n_pad, n_pad), adj.dtype).at[:n, :n].set(adj)
    else:
        adj_in = adj  # no wrapper-side full pad/cast pass over the N^2 matrix
    h_p = jnp.zeros((n_pad, f_out_pad), jnp.bfloat16).at[:n, :f_out].set(
        h.astype(jnp.bfloat16))
    b_p = jnp.zeros((1, f_out_pad), jnp.float32).at[0, :f_out].set(
        bias.astype(jnp.float32))

    vmem_limit = max(32 * 1024 * 1024, int(1.3 * est_vmem))

    if use_rowslab:
        grid = (n_pad // tm,)
        grid_spec = pltpu.PrefetchScalarGridSpec(
            num_scalar_prefetch=0,
            grid=grid,
            in_specs=[
                pl.BlockSpec((tm, n_pad), lambda i: (i, 0)),         # adj slab
                pl.BlockSpec((n_pad, f_out_pad), lambda i: (0, 0)),  # resident H
                pl.BlockSpec((1, f_out_pad), lambda i: (0, 0)),      # resident b
            ],
            out_specs=pl.BlockSpec((tm, f_out_pad), lambda i: (i, 0)),
        )
        kernel = _gcn_rowslab_kernel
        dim_sem = ("parallel",)
        h_reads = 1
    else:
        grid = (n_pad // tm, n_pad // tm)
        grid_spec = pltpu.PrefetchScalarGridSpec(
            num_scalar_prefetch=0,
            grid=grid,
            in_specs=[
                pl.BlockSpec((tm, tm), lambda i, k: (i, k)),          # adj tile
                pl.BlockSpec((tm, f_out_pad), lambda i, k: (k, 0)),   # H tile
                pl.BlockSpec((1, f_out_pad), lambda i, k: (0, 0)),    # resident b
            ],
            out_specs=pl.BlockSpec((tm, f_out_pad), lambda i, k: (i, 0)),
            scratch_shapes=[pltpu.VMEM((tm, f_out_pad), jnp.float32)],
        )
        kernel = _gcn_ktile_kernel
        dim_sem = ("parallel", "arbitrary")
        h_reads = grid[0]

    cost = pl.CostEstimate(
        flops=2 * n_pad * n_pad * f_out_pad,
        transcendentals=0,
        bytes_accessed=(n_pad * n_pad * adj_bytes
                        + h_p.size * 2 * h_reads
                        + b_p.size * 4
                        + n_pad * f_out_pad * out_bytes),
    )

    out_p = pl.pallas_call(
        kernel,
        out_shape=jax.ShapeDtypeStruct((n_pad, f_out_pad), out_dtype),
        grid_spec=grid_spec,
        compiler_params=pltpu.CompilerParams(
            dimension_semantics=dim_sem,
            vmem_limit_bytes=vmem_limit,
        ),
        cost_estimate=cost,
    )(adj_in, h_p, b_p)

    # Padded rows/cols produce relu(bias)/0 -- this slice removes them.
    return out_p[:n, :f_out]


if __name__ == "__main__":
    # 512 nodes -> row-slab path uses TM=256, grid=(2,) (megacore-friendly).
    N, F_IN, F_OUT = 512, 32, 16

    key = jax.random.PRNGKey(0)
    k_feat, k_adj, k_w, k_b = jax.random.split(key, 4)

    features = jax.random.normal(k_feat, (N, F_IN), dtype=jnp.float32)
    # Symmetric-ish adjacency with self loops (values in [0, ~1.5)).
    adj = jax.random.uniform(k_adj, (N, N), dtype=jnp.float32)
    adj = 0.5 * (adj + adj.T) + jnp.eye(N, dtype=jnp.float32)

    # "Linear" params in torch layout: weight [out, in], bias [out].
    bound = 1.0 / (F_IN ** 0.5)
    weight = jax.random.uniform(k_w, (F_OUT, F_IN), dtype=jnp.float32,
                                minval=-bound, maxval=bound)
    bias = jax.random.uniform(k_b, (F_OUT,), dtype=jnp.float32,
                              minval=-bound, maxval=bound)

    ref = jnp.maximum(jnp.matmul(adj, features) @ weight.T + bias, 0.0)

    # Default row-slab path (1-D parallel grid, resident H, no accumulator).
    out = gcn_update(features, adj, weight, bias)
    jax.block_until_ready(out)
    assert out.shape == (N, F_OUT)
    rel = jnp.max(jnp.abs(out - ref)) / (jnp.max(jnp.abs(ref)) + 1e-6)
    assert rel < 2e-2, f"rowslab rel_err={rel}"

    # K-tiled fallback path, exercised explicitly so both code paths stay valid.
    out_k = gcn_update(features, adj, weight, bias, tile_n=256, force_ktile=True)
    jax.block_until_ready(out_k)
    rel_k = jnp.max(jnp.abs(out_k - ref)) / (jnp.max(jnp.abs(ref)) + 1e-6)
    assert rel_k < 2e-2, f"ktile rel_err={rel_k}"

    print("KERNEL_OK")
</pallas_src>

<mosaic_0001>
module attributes {stable_mosaic.version = 11 : i64} {
  func.func @_gcn_rowslab_kernel(%arg0: i32, %arg1: memref<256x512xf32, #tpu.memory_space<vmem>>, %arg2: memref<512x128xbf16, #tpu.memory_space<vmem>>, %arg3: memref<1x128xf32, #tpu.memory_space<vmem>>, %arg4: memref<256x128xf32, #tpu.memory_space<vmem>>) attributes {dimension_semantics = [#tpu.dimension_semantics<parallel>], iteration_bounds = array<i64: 2>, scalar_prefetch = 0 : i64, scratch_operands = 0 : i64, tpu.core_type = #tpu.core_type<tc>, window_params = [{transform_indices = @transform_0, window_bounds = array<i64: 256, 512>}, {pipeline_mode = #tpu.pipeline_mode<synchronous>, transform_indices = @transform_1, window_bounds = array<i64: 512, 128>}, {pipeline_mode = #tpu.pipeline_mode<synchronous>, transform_indices = @transform_2, window_bounds = array<i64: 1, 128>}, {transform_indices = @transform_3, window_bounds = array<i64: 256, 128>}]} {
    %c0 = arith.constant 0 : index
    %c0_0 = arith.constant 0 : index
    %0 = vector.load %arg1[%c0, %c0_0] : memref<256x512xf32, #tpu.memory_space<vmem>>, vector<256x512xf32>
    %1 = arith.truncf %0 : vector<256x512xf32> to vector<256x512xbf16>
    %c0_1 = arith.constant 0 : index
    %c0_2 = arith.constant 0 : index
    %2 = vector.load %arg2[%c0_1, %c0_2] : memref<512x128xbf16, #tpu.memory_space<vmem>>, vector<512x128xbf16>
    %cst = arith.constant dense<0.000000e+00> : vector<256x128xf32>
    %3 = tpu.matmul %1, %2, %cst {dimension_numbers = #tpu.dot_dimension_numbers<[1], [0], [0], [1], [0, 0, 1, 1], [], []>} : vector<256x512xbf16>, vector<512x128xbf16>, vector<256x128xf32> -> vector<256x128xf32>
    %c0_3 = arith.constant 0 : index
    %c0_4 = arith.constant 0 : index
    %4 = vector.load %arg3[%c0_3, %c0_4] : memref<1x128xf32, #tpu.memory_space<vmem>>, vector<1x128xf32>
    %5 = vector.broadcast %4 : vector<1x128xf32> to vector<256x128xf32>
    %6 = arith.addf %3, %5 : vector<256x128xf32>
    %cst_5 = arith.constant 0.000000e+00 : f32
    %7 = vector.broadcast %cst_5 : f32 to vector<256x128xf32>
    %8 = arith.maximumf %6, %7 : vector<256x128xf32>
    %c0_6 = arith.constant 0 : index
    %c0_7 = arith.constant 0 : index
    %9 = vector.load %arg4[%c0_6, %c0_7] : memref<256x128xf32, #tpu.memory_space<vmem>>, vector<256x128xf32>
    tpu.vector_store %arg4[%c0_6, %c0_7], %8 {strides = array<i32>} : memref<256x128xf32, #tpu.memory_space<vmem>>, vector<256x128xf32>,
    return
  }
  func.func @transform_0(%arg0: i32) -> (i32, i32) {
    %c0_i32 = arith.constant 0 : i32
    %c0_i32_0 = arith.constant 0 : i32
    return %arg0, %c0_i32 : i32, i32
  }
  func.func @transform_1(%arg0: i32) -> (i32, i32) {
    %c0_i32 = arith.constant 0 : i32
    %c0_i32_0 = arith.constant 0 : i32
    %c0_i32_1 = arith.constant 0 : i32
    return %c0_i32, %c0_i32_0 : i32, i32
  }
  func.func @transform_2(%arg0: i32) -> (i32, i32) {
    %c0_i32 = arith.constant 0 : i32
    %c0_i32_0 = arith.constant 0 : i32
    %c0_i32_1 = arith.constant 0 : i32
    return %c0_i32, %c0_i32_0 : i32, i32
  }
  func.func @transform_3(%arg0: i32) -> (i32, i32) {
    %c0_i32 = arith.constant 0 : i32
    %c0_i32_0 = arith.constant 0 : i32
    return %arg0, %c0_i32 : i32, i32
  }
}

</mosaic_0001>

<bundles_post_ra>
// kernel: gcn_update.1
= control target key start
LH: loop header
LB: loop body
LE: loop exit
PB: predicated region body
PF: predicated region fallthrough
CT: control target
= control target key end

     0   :  { %8 = vsyncpa [#allocation3], 0  ;;  %s1829_s0 = inlined_call_operand.hbm [shape: f32[512,512], index: 0, kind: input, shape index: {}]   ;;  %s1830_s1 = inlined_call_operand.vmem [shape: bf16[512,128], index: 1, kind: input, shape index: {}]   ;;  %s1831_s2 = inlined_call_operand.vmem [shape: f32[1,128], index: 2, kind: input, shape index: {}]   ;;  %s1832_s3 = inlined_call_operand.vmem [shape: f32[512,128], index: 3, kind: output, shape index: {}]  }
   0x1   :  { %10 = vsyncpa [#allocation3 + $0x1], 0  ;;  %s1441_s12 = smov 0   ;;  %s1443_s13 = smov 0  }
   0x2   :  { %s1445_s14 = smov 0   ;;  %s1447_s15 = smov 0  }
   0x3 LB: > { %s1135_s16 = sadd.s32 4294967295, %s1417_s15   ;;  %s1461_s17 = sadd.s32 1, %s1417_s15   ;;  %s1417_s15 = sphi %s1447_s15, %s1839_s15   ;;  %s1413_s14 = sphi %s1445_s14, %s1838_s14   ;;  %s1409_s13 = sphi %s1443_s13, %s1837_s13   ;;  %s1405_s12 = sphi %s1441_s12, %s1836_s12  }
   0x4   : > { %s20_s18 = ssub.s32 %s1417_s15, %s1461_s17  ;;  %s23_s19 = sadd.s32 1, %s1413_s14 }
   0x5   : > { %p21_p0 = scmp.eq.s32.totalorder %s20_s18, 0  ;;  %p30_p1 = scmp.ne.s32.totalorder %s1413_s14, %s1409_s13 }
   0x6   : > { %p31_p2 = scmp.eq.s32.totalorder %s1417_s15, 0  ;;  %p36_p3 = scmp.ne.s32.totalorder %s1409_s13, %s1405_s12 }
   0x7   : > { %s1471_s20 = scalar_select %p21_p0, %s1413_s14, %s23_s19  }
   0x8   : > { %p1473_p4 = por %p31_p2, %p30_p1  ;;  %p37_p5 = scmp.eq.s32.totalorder %s1135_s16, 0 }
   0x9   : > { %p1317_p6 = scmp.lt.s32.totalorder %s1417_s15, 2  ;;  %s134_s23 = sand.u32 1, %s1413_s14  }
   0xa   : > { %p1480_p7 = por %p37_p5, %p36_p3  ;;  %s1139_s24 = sshll.u32 %s134_s23, 10 }
   0xb   : > { %s1278_s25 = sshll.u32 %s1417_s15, 10  ;;  %s138_s29 = scalar_lea.vmem [#allocation2], %s1139_s24 }
   0xc   : > { %s144_s28 = scalar_lea.hbm %s1829_s0, %s1278_s25  ;;  %s147_s30 = sshll.u32 %s138_s29, 4  ;;  %s148_s30 = int_to_ptr.vmem [resolvable:$true] %s147_s30 }
   0xd   : > { %s145_s4 = sshll.u32 %s144_s28, 4  ;;  %p1491_p8 = pnand %p1317_p6, %p1473_p4  ;;  %s146_s4 = int_to_ptr.hbm [resolvable:$true] %s145_s4 }
   0xe   : > { %p1143_p9 = scmp.ge.s32.totalorder %s1417_s15, 1  ;;  %s135_s6 = scalar_lea.sflag [#allocation3], %s134_s23 }
   0xf   : > { %s1353_s7 = sshra.s32 %s146_s4, 4  ;;  %p1357_p11 = pneg %p1491_p8  ;;  %s1354_s7 = int_to_ptr.hbm [resolvable:$true] %s1353_s7 }
  0x10   : > { %s1355_s8 = scalar_lea.hbm %s1354_s7, 1024  ;;  %s1360_s11 = scalar_lea.hbm %s1829_s0, 2048 }
  0x11   : > { %p1356_p10 = scmp.ne.s32.totalorder %s1354_s7, %s1355_s8  ;;  %p1361_p0 = scmp.lt.s32.totalorder %s1354_s7, %s1829_s0 }
  0x12   : > { %p1362_p1 = scmp.lt.s32.totalorder %s1360_s11, %s1355_s8 }
  0x13   : > { %p1358_p12 = pnand %p1357_p11, %p1356_p10 }
  0x14   : > { %p1363_p2 = por %p1362_p1, %p1361_p0 }
  0x15   : > { %p1359_p13 = pneg %p1358_p12 }
  0x17   : > { %p1364_p3 = pnand %p1363_p2, %p1359_p13 }
  0x19   : > { %1367 = shalt.err (!%p1364_p3)
}
  0x1a   : > { %s1419_s19 = smov 512   ;;  %s1420_s21 = smov 32  }
  0x1b   : > { %1316 = dma.hbm_to_vmem [thread:$0]  (!%p1491_p8), %s146_s4, 16384, %s148_s30, %s135_s6, %s1419_s19, %s1419_s19, %s1420_s21  }
  0x1c   : > { %p155_p4 = scmp.lt.s32.totalorder %s1417_s15, 3 }
  0x1e   : > { %p156_p5 = pnand %p1143_p9, %p155_p4 }
  0x1f   : > { %s161_s23 = sand.u32 (!%p156_p5), 1, %s1409_s13  }
  0x20   : > { %159 = sbr.rel (%p156_p5) target bundleno = 459 (0x1cb), region = 32  ;;  %s1144_s24 = sshll.u32 (!%p156_p5), %s161_s23, 10 }
  0x21   : > { %s162_s25 = scalar_lea.sflag (!%p156_p5), [#allocation3], %s161_s23  ;;  %s1510_s26 = scalar_lea.vmem (!%p156_p5), [#allocation2], %s1144_s24 }
  0x25   : > { %1400 = dma.done.wait (%p1480_p7), %s162_s25, 16384  }
  0x26   : > { %1402 = vsyncadd (%p1480_p7), %s162_s25, 4294950912  ;;  %v1286_v0 = vld [vmem:[%s1830_s1 + $0x38] sm:$0xff]  ;;  %v1285_v4 = vld [vmem:[%s1830_s1 + $0x30] sm:$0xff]  ;;  %s1145_s6 = sshll.u32 %s1135_s16, 5 }
  0x27   : > { %v1294_v1 = vld [vmem:[%s1830_s1 + $0x78] sm:$0xff]  ;;  %648 = vmatpush.bf16.msra.mxu0 %v1286_v0  ;;  %v1293_v5 = vld [vmem:[%s1830_s1 + $0x70] sm:$0xff]  ;;  %v1284_v8 = vld [vmem:[%s1830_s1 + $0x28] sm:$0xff]  ;;  %p191_p6 = scmp.lt.s32.totalorder %s1145_s6, 63 }
  0x28   : > { %v1302_v2 = vld [vmem:[%s1830_s1 + $0xb8] sm:$0xff]  ;;  %737 = vmatpush.bf16.msra.mxu1 %v1294_v1  ;;  %v1301_v6 = vld [vmem:[%s1830_s1 + $0xb0] sm:$0xff]  ;;  %v1292_v9 = vld [vmem:[%s1830_s1 + $0x68] sm:$0xff] }
  0x29   : > { %v1310_v3 = vld [vmem:[%s1830_s1 + $0xf8] sm:$0xff]  ;;  %826 = vmatpush.bf16.msra.mxu2 %v1302_v2  ;;  %v1309_v7 = vld [vmem:[%s1830_s1 + $0xf0] sm:$0xff]  ;;  %v1300_v10 = vld [vmem:[%s1830_s1 + $0xa8] sm:$0xff]  ;;  %s1841_s6 = smov (!%p191_p6, %s1145_s6), 63 }
  0x2a   : > { %915 = vmatpush.bf16.msra.mxu3 %v1310_v3  ;;  %v1308_v11 = vld [vmem:[%s1830_s1 + $0xe8] sm:$0xff]  ;;  %v1283_v12 = vld [vmem:[%s1830_s1 + $0x20] sm:$0xff]  ;;  %v1282_v16 = vld [vmem:[%s1830_s1 + $0x18] sm:$0xff]  ;;  %s1146_s15 = sshll.u32 %s1841_s6, 3 }
  0x2b   : > { %649 = vmatpush.bf16.msra.mxu0 %v1285_v4  ;;  %v1291_v13 = vld [vmem:[%s1830_s1 + $0x60] sm:$0xff]  ;;  %v1290_v17 = vld [vmem:[%s1830_s1 + $0x58] sm:$0xff]  ;;  %v1281_v20 = vld [vmem:[%s1830_s1 + $0x10] sm:$0xff]  ;;  %s1696_s22 = scalar_lea.vmem %s1832_s3, %s1146_s15 }
  0x2c   : > { %738 = vmatpush.bf16.msra.mxu1 %v1293_v5  ;;  %v1299_v14 = vld [vmem:[%s1830_s1 + $0xa0] sm:$0xff]  ;;  %v1298_v18 = vld [vmem:[%s1830_s1 + $0x98] sm:$0xff]  ;;  %v1289_v21 = vld [vmem:[%s1830_s1 + $0x50] sm:$0xff] }
  0x2d   : > { %827 = vmatpush.bf16.msra.mxu2 %v1301_v6  ;;  %v1307_v15 = vld [vmem:[%s1830_s1 + $0xe0] sm:$0xff]  ;;  %v1306_v19 = vld [vmem:[%s1830_s1 + $0xd8] sm:$0xff]  ;;  %v1297_v22 = vld [vmem:[%s1830_s1 + $0x90] sm:$0xff] }
  0x2e   : > { %916 = vmatpush.bf16.msra.mxu3 %v1309_v7  ;;  %v1305_v23 = vld [vmem:[%s1830_s1 + $0xd0] sm:$0xff]  ;;  %v1280_v24 = vld [vmem:[%s1830_s1 + $0x8] sm:$0xff]  ;;  %v1279_v28 = vld [vmem:[%s1830_s1] sm:$0xff] }
  0x2f   : > { %650 = vmatpush.bf16.msra.mxu0 %v1284_v8  ;;  %v1288_v25 = vld [vmem:[%s1830_s1 + $0x48] sm:$0xff]  ;;  %v1287_v29 = vld [vmem:[%s1830_s1 + $0x40] sm:$0xff]  ;;  %v198_v36 = vld [vmem:[%s1510_s26 + $0x10] sm:$0xff] }
  0x30   : > { %739 = vmatpush.bf16.msra.mxu1 %v1292_v9  ;;  %v1296_v26 = vld [vmem:[%s1830_s1 + $0x88] sm:$0xff]  ;;  %v1295_v30 = vld [vmem:[%s1830_s1 + $0x80] sm:$0xff]  ;;  %v202_v37 = vld [vmem:[%s1510_s26 + $0x30] sm:$0xff] }
  0x31   : > { %828 = vmatpush.bf16.msra.mxu2 %v1300_v10  ;;  %v1304_v27 = vld [vmem:[%s1830_s1 + $0xc8] sm:$0xff]  ;;  %v1303_v31 = vld [vmem:[%s1830_s1 + $0xc0] sm:$0xff]  ;;  %v199_v38 = vld [vmem:[%s1510_s26 + $0x18] sm:$0xff]  ;;  %v326_v42 = vpack.c.bf16 %v202_v37, %v198_v36 }
  0x32   : > { %917 = vmatpush.bf16.msra.mxu3 %v1308_v11  ;;  %v196_v32 = vld [vmem:[%s1510_s26] sm:$0xff]  ;;  %v197_v34 = vld [vmem:[%s1510_s26 + $0x8] sm:$0xff]  ;;  %v203_v39 = vld [vmem:[%s1510_s26 + $0x38] sm:$0xff] }
  0x33   : > { %651 = vmatpush.bf16.msra.mxu0 %v1283_v12  ;;  %v200_v33 = vld [vmem:[%s1510_s26 + $0x20] sm:$0xff]  ;;  %v201_v35 = vld [vmem:[%s1510_s26 + $0x28] sm:$0xff]  ;;  %v327_v43 = vpack.c.bf16 %v203_v39, %v199_v38  ;;  %v206_v48 = vld [vmem:[%s1510_s26 + $0x50] sm:$0xff] }
  0x34   : > { %740 = vmatpush.bf16.msra.mxu1 %v1291_v13  ;;  %v324_v40 = vpack.c.bf16 %v200_v33, %v196_v32  ;;  %v325_v41 = vpack.c.bf16 %v201_v35, %v197_v34  ;;  %v204_v44 = vld [vmem:[%s1510_s26 + $0x40] sm:$0xff]  ;;  %v205_v46 = vld [vmem:[%s1510_s26 + $0x48] sm:$0xff]  ;;  %v210_v49 = vld [vmem:[%s1510_s26 + $0x70] sm:$0xff] }
  0x35   : > { %829 = vmatpush.bf16.msra.mxu2 %v1299_v14  ;;  %v208_v45 = vld [vmem:[%s1510_s26 + $0x60] sm:$0xff]  ;;  %v209_v47 = vld [vmem:[%s1510_s26 + $0x68] sm:$0xff]  ;;  %v207_v50 = vld [vmem:[%s1510_s26 + $0x58] sm:$0xff]  ;;  %v330_v54 = vpack.c.bf16 %v210_v49, %v206_v48 }
  0x36   : > { %918 = vmatpush.bf16.msra.mxu3 %v1307_v15  ;;  %v211_v51 = vld [vmem:[%s1510_s26 + $0x78] sm:$0xff]  ;;  %v328_v52 = vpack.c.bf16 %v208_v45, %v204_v44  ;;  %v329_v53 = vpack.c.bf16 %v209_v47, %v205_v46  ;;  %v212_v56 = vld [vmem:[%s1510_s26 + $0x80] sm:$0xff]  ;;  %v213_v58 = vld [vmem:[%s1510_s26 + $0x88] sm:$0xff] }
  0x37   : > { %652 = vmatpush.bf16.msra.mxu0 %v1282_v16  ;;  %v331_v55 = vpack.c.bf16 %v211_v51, %v207_v50  ;;  %v216_v57 = vld [vmem:[%s1510_s26 + $0xa0] sm:$0xff]  ;;  %v217_v59 = vld [vmem:[%s1510_s26 + $0xa8] sm:$0xff]  ;;  %v214_v60 = vld [vmem:[%s1510_s26 + $0x90] sm:$0xff] }
  0x38   : > { %741 = vmatpush.bf16.msra.mxu1 %v1290_v17  ;;  %v218_v61 = vld [vmem:[%s1510_s26 + $0xb0] sm:$0xff]  ;;  %v215_v62 = vld [vmem:[%s1510_s26 + $0x98] sm:$0xff]  ;;  %v332_v0 = vpack.c.bf16 %v216_v57, %v212_v56  ;;  %v333_v1 = vpack.c.bf16 %v217_v59, %v213_v58  ;;  %v220_v4 = vld [vmem:[%s1510_s26 + $0xc0] sm:$0xff] }
  0x39   : > { %830 = vmatpush.bf16.msra.mxu2 %v1298_v18  ;;  %v219_v63 = vld [vmem:[%s1510_s26 + $0xb8] sm:$0xff]  ;;  %v334_v2 = vpack.c.bf16 %v218_v61, %v214_v60  ;;  %v224_v5 = vld [vmem:[%s1510_s26 + $0xe0] sm:$0xff]  ;;  %v221_v6 = vld [vmem:[%s1510_s26 + $0xc8] sm:$0xff] }
  0x3a   : > { %919 = vmatpush.bf16.msra.mxu3 %v1306_v19  ;;  %v335_v3 = vpack.c.bf16 %v219_v63, %v215_v62  ;;  %v225_v7 = vld [vmem:[%s1510_s26 + $0xe8] sm:$0xff]  ;;  %v222_v8 = vld [vmem:[%s1510_s26 + $0xd0] sm:$0xff]  ;;  %v223_v10 = vld [vmem:[%s1510_s26 + $0xd8] sm:$0xff]  ;;  %v336_v12 = vpack.c.bf16 %v224_v5, %v220_v4 }
  0x3b   : > { %653 = vmatpush.bf16.msra.mxu0 %v1281_v20  ;;  %v226_v9 = vld [vmem:[%s1510_s26 + $0xf0] sm:$0xff]  ;;  %v227_v11 = vld [vmem:[%s1510_s26 + $0xf8] sm:$0xff]  ;;  %v337_v13 = vpack.c.bf16 %v225_v7, %v221_v6  ;;  %v228_v16 = vld [vmem:[%s1510_s26 + $0x100] sm:$0xff] }
  0x3c   : > { %742 = vmatpush.bf16.msra.mxu1 %v1289_v21  ;;  %v338_v14 = vpack.c.bf16 %v226_v9, %v222_v8  ;;  %v339_v15 = vpack.c.bf16 %v227_v11, %v223_v10  ;;  %v232_v17 = vld [vmem:[%s1510_s26 + $0x120] sm:$0xff]  ;;  %v229_v18 = vld [vmem:[%s1510_s26 + $0x108] sm:$0xff]  ;;  %v230_v20 = vld [vmem:[%s1510_s26 + $0x110] sm:$0xff] }
  0x3d   : > { %831 = vmatpush.bf16.msra.mxu2 %v1297_v22  ;;  %v233_v19 = vld [vmem:[%s1510_s26 + $0x128] sm:$0xff]  ;;  %v234_v21 = vld [vmem:[%s1510_s26 + $0x130] sm:$0xff]  ;;  %v231_v22 = vld [vmem:[%s1510_s26 + $0x118] sm:$0xff] }
  0x3e   : > { %920 = vmatpush.bf16.msra.mxu3 %v1305_v23  ;;  %v235_v23 = vld [vmem:[%s1510_s26 + $0x138] sm:$0xff]  ;;  %v238_v32 = vld [vmem:[%s1510_s26 + $0x150] sm:$0xff]  ;;  %v265_v4 = vld [vmem:[%s1510_s26 + $0x228] sm:$0xff] }
  0x3f   : > { %654 = vmatpush.bf16.msra.mxu0 %v1280_v24  ;;  %v340_v24 = vpack.c.bf16 %v232_v17, %v228_v16  ;;  %v242_v33 = vld [vmem:[%s1510_s26 + $0x170] sm:$0xff]  ;;  %v239_v34 = vld [vmem:[%s1510_s26 + $0x158] sm:$0xff] }
  0x40   : > { %743 = vmatpush.bf16.msra.mxu1 %v1288_v25  ;;  %v341_v25 = vpack.c.bf16 %v233_v19, %v229_v18  ;;  %v243_v35 = vld [vmem:[%s1510_s26 + $0x178] sm:$0xff]  ;;  %v346_v38 = vpack.c.bf16 %v242_v33, %v238_v32  ;;  %v246_v44 = vld [vmem:[%s1510_s26 + $0x190] sm:$0xff] }
  0x41   : > { %832 = vmatpush.bf16.msra.mxu2 %v1296_v26  ;;  %v342_v26 = vpack.c.bf16 %v234_v21, %v230_v20  ;;  %v347_v39 = vpack.c.bf16 %v243_v35, %v239_v34  ;;  %v250_v45 = vld [vmem:[%s1510_s26 + $0x1b0] sm:$0xff]  ;;  %v247_v46 = vld [vmem:[%s1510_s26 + $0x198] sm:$0xff] }
  0x42   : > { %921 = vmatpush.bf16.msra.mxu3 %v1304_v27  ;;  %v343_v27 = vpack.c.bf16 %v235_v23, %v231_v22  ;;  %v251_v47 = vld [vmem:[%s1510_s26 + $0x1b8] sm:$0xff]  ;;  %v350_v50 = vpack.c.bf16 %v250_v45, %v246_v44  ;;  %v254_v56 = vld [vmem:[%s1510_s26 + $0x1d0] sm:$0xff] }
  0x43   : > { %655 = vmatpush.bf16.msra.mxu0 %v1279_v28  ;;  %v236_v28 = vld [vmem:[%s1510_s26 + $0x140] sm:$0xff]  ;;  %v351_v51 = vpack.c.bf16 %v251_v47, %v247_v46  ;;  %v258_v57 = vld [vmem:[%s1510_s26 + $0x1f0] sm:$0xff]  ;;  %v255_v58 = vld [vmem:[%s1510_s26 + $0x1d8] sm:$0xff] }
  0x44   : > { %744 = vmatpush.bf16.msra.mxu1 %v1287_v29  ;;  %v240_v29 = vld [vmem:[%s1510_s26 + $0x160] sm:$0xff]  ;;  %v259_v59 = vld [vmem:[%s1510_s26 + $0x1f8] sm:$0xff]  ;;  %v354_v62 = vpack.c.bf16 %v258_v57, %v254_v56  ;;  %v262_v5 = vld [vmem:[%s1510_s26 + $0x210] sm:$0xff] }
  0x45   : > { %833 = vmatpush.bf16.msra.mxu2 %v1295_v30  ;;  %v237_v30 = vld [vmem:[%s1510_s26 + $0x148] sm:$0xff]  ;;  %v344_v36 = vpack.c.bf16 %v240_v29, %v236_v28  ;;  %v355_v63 = vpack.c.bf16 %v259_v59, %v255_v58  ;;  %v266_v6 = vld [vmem:[%s1510_s26 + $0x230] sm:$0xff]  ;;  %v263_v7 = vld [vmem:[%s1510_s26 + $0x218] sm:$0xff] }
  0x46   : > { %922 = vmatpush.bf16.msra.mxu3 %v1303_v31  ;;  %656 = vmatmul.bf16.vlgmr.msra.gmra.mxu0 %v324_v40  ;;  %v241_v31 = vld [vmem:[%s1510_s26 + $0x168] sm:$0xff]  ;;  %v244_v40 = vld [vmem:[%s1510_s26 + $0x180] sm:$0xff]  ;;  %v267_v8 = vld [vmem:[%s1510_s26 + $0x238] sm:$0xff] }
  0x47   : > { %745 = vmatmul.bf16.vlgmr.msra.gmra.mxu1 %v325_v41  ;;  %v345_v37 = vpack.c.bf16 %v241_v31, %v237_v30  ;;  %v248_v41 = vld [vmem:[%s1510_s26 + $0x1a0] sm:$0xff]  ;;  %v273_v28 = vld [vmem:[%s1510_s26 + $0x268] sm:$0xff]  ;;  %v270_v29 = vld [vmem:[%s1510_s26 + $0x250] sm:$0xff] }
  0x48   : > { %834 = vmatmul.bf16.vlgmr.msra.gmra.mxu2 %v326_v42  ;;  %v245_v42 = vld [vmem:[%s1510_s26 + $0x188] sm:$0xff]  ;;  %v348_v48 = vpack.c.bf16 %v248_v41, %v244_v40  ;;  %v274_v30 = vld [vmem:[%s1510_s26 + $0x270] sm:$0xff]  ;;  %v271_v31 = vld [vmem:[%s1510_s26 + $0x258] sm:$0xff] }
  0x49   : > { %923 = vmatmul.bf16.vlgmr.msra.gmra.mxu3 %v327_v43  ;;  %v249_v43 = vld [vmem:[%s1510_s26 + $0x1a8] sm:$0xff]  ;;  %v275_v32 = vld [vmem:[%s1510_s26 + $0x278] sm:$0xff]  ;;  %v362_v41 = vpack.c.bf16 %v274_v30, %v270_v29  ;;  %v278_v59 = vld [vmem:[%s1510_s26 + $0x290] sm:$0xff] }
  0x4a   : > { %v349_v49 = vpack.c.bf16 %v249_v43, %v245_v42  ;;  %v363_v42 = vpack.c.bf16 %v275_v32, %v271_v31  ;;  %v277_v57 = vld [vmem:[%s1510_s26 + $0x288] sm:$0xff]  ;;  %v291_v29 = vld [vmem:[%s1510_s26 + $0x2f8] sm:$0xff] }
  0x4b   : > { %v281_v58 = vld [vmem:[%s1510_s26 + $0x2a8] sm:$0xff] }
  0x56   : > { %661 = vmatmul.bf16.gmra.mxu0 %v328_v52  ;;  %v252_v52 = vld [vmem:[%s1510_s26 + $0x1c0] sm:$0xff] }
  0x57   : > { %750 = vmatmul.bf16.gmra.mxu1 %v329_v53  ;;  %v256_v53 = vld [vmem:[%s1510_s26 + $0x1e0] sm:$0xff] }
  0x58   : > { %839 = vmatmul.bf16.gmra.mxu2 %v330_v54  ;;  %v253_v54 = vld [vmem:[%s1510_s26 + $0x1c8] sm:$0xff]  ;;  %v352_v60 = vpack.c.bf16 %v256_v53, %v252_v52 }
  0x59   : > { %928 = vmatmul.bf16.gmra.mxu3 %v331_v55  ;;  %v257_v55 = vld [vmem:[%s1510_s26 + $0x1e8] sm:$0xff] }
  0x5a   : > { %v353_v61 = vpack.c.bf16 %v257_v55, %v253_v54  ;;  %v276_v54 = vld [vmem:[%s1510_s26 + $0x280] sm:$0xff] }
  0x5b   : > { %v280_v55 = vld [vmem:[%s1510_s26 + $0x2a0] sm:$0xff] }
  0x66   : > { %666 = vmatmul.bf16.gmra.mxu0 %v332_v0  ;;  %v1679_v0 = vld [vmem:[%s1831_s2] ss:$0 sm:$0xff] }
  0x67   : > { %755 = vmatmul.bf16.gmra.mxu1 %v333_v1  ;;  %v260_v1 = vld [vmem:[%s1510_s26 + $0x200] sm:$0xff] }
  0x68   : > { %844 = vmatmul.bf16.gmra.mxu2 %v334_v2  ;;  %v264_v2 = vld [vmem:[%s1510_s26 + $0x220] sm:$0xff] }
  0x69   : > { %933 = vmatmul.bf16.gmra.mxu3 %v335_v3  ;;  %v261_v3 = vld [vmem:[%s1510_s26 + $0x208] sm:$0xff]  ;;  %v356_v9 = vpack.c.bf16 %v264_v2, %v260_v1 }
  0x6a   : > { %v357_v10 = vpack.c.bf16 %v265_v4, %v261_v3  ;;  %v364_v3 = vpack.c.bf16 %v280_v55, %v276_v54  ;;  %v365_v4 = vpack.c.bf16 %v281_v58, %v277_v57  ;;  %v293_v54 = vld [vmem:[%s1510_s26 + $0x308] sm:$0xff]  ;;  %v298_v57 = vld [vmem:[%s1510_s26 + $0x330] sm:$0xff]  ;;  %v295_v58 = vld [vmem:[%s1510_s26 + $0x318] sm:$0xff] }
  0x6b   : > { %v297_v55 = vld [vmem:[%s1510_s26 + $0x328] sm:$0xff] }
  0x76   : > { %671 = vmatmul.bf16.gmra.mxu0 %v336_v12 }
  0x77   : > { %760 = vmatmul.bf16.gmra.mxu1 %v337_v13  ;;  %v358_v13 = vpack.c.bf16 %v266_v6, %v262_v5 }
  0x78   : > { %849 = vmatmul.bf16.gmra.mxu2 %v338_v14  ;;  %v359_v14 = vpack.c.bf16 %v267_v8, %v263_v7 }
  0x79   : > { %938 = vmatmul.bf16.gmra.mxu3 %v339_v15 }
  0x86   : > { %676 = vmatmul.bf16.gmra.mxu0 %v340_v24  ;;  %v268_v24 = vld [vmem:[%s1510_s26 + $0x240] sm:$0xff] }
  0x87   : > { %765 = vmatmul.bf16.gmra.mxu1 %v341_v25  ;;  %v272_v25 = vld [vmem:[%s1510_s26 + $0x260] sm:$0xff] }
  0x88   : > { %854 = vmatmul.bf16.gmra.mxu2 %v342_v26 }
  0x89   : > { %943 = vmatmul.bf16.gmra.mxu3 %v343_v27  ;;  %v269_v27 = vld [vmem:[%s1510_s26 + $0x248] sm:$0xff] }
  0x96   : > { %681 = vmatmul.bf16.gmra.mxu0 %v344_v36  ;;  %v360_v36 = vpack.c.bf16 %v272_v25, %v268_v24  ;;  %v285_v24 = vld [vmem:[%s1510_s26 + $0x2c8] sm:$0xff] }
  0x97   : > { %770 = vmatmul.bf16.gmra.mxu1 %v345_v37  ;;  %v361_v37 = vpack.c.bf16 %v273_v28, %v269_v27  ;;  %v289_v25 = vld [vmem:[%s1510_s26 + $0x2e8] sm:$0xff]  ;;  %v290_v27 = vld [vmem:[%s1510_s26 + $0x2f0] sm:$0xff]  ;;  %v287_v28 = vld [vmem:[%s1510_s26 + $0x2d8] sm:$0xff] }
  0x98   : > { %859 = vmatmul.bf16.gmra.mxu2 %v346_v38 }
  0x99   : > { %948 = vmatmul.bf16.gmra.mxu3 %v347_v39 }
  0xa6   : > { %686 = vmatmul.bf16.gmra.mxu0 %v348_v48 }
  0xa7   : > { %775 = vmatmul.bf16.gmra.mxu1 %v349_v49 }
  0xa8   : > { %864 = vmatmul.bf16.gmra.mxu2 %v350_v50 }
  0xa9   : > { %953 = vmatmul.bf16.gmra.mxu3 %v351_v51 }
  0xb6   : > { %691 = vmatmul.bf16.gmra.mxu0 %v352_v60  ;;  %v282_v60 = vld [vmem:[%s1510_s26 + $0x2b0] sm:$0xff] }
  0xb7   : > { %780 = vmatmul.bf16.gmra.mxu1 %v353_v61  ;;  %v279_v61 = vld [vmem:[%s1510_s26 + $0x298] sm:$0xff]  ;;  %v366_v8 = vpack.c.bf16 %v282_v60, %v278_v59 }
  0xb8   : > { %869 = vmatmul.bf16.gmra.mxu2 %v354_v62  ;;  %v283_v62 = vld [vmem:[%s1510_s26 + $0x2b8] sm:$0xff] }
  0xb9   : > { %958 = vmatmul.bf16.gmra.mxu3 %v355_v63  ;;  %v299_v59 = vld [vmem:[%s1510_s26 + $0x338] sm:$0xff] }
  0xc3   : > { %v657_v11 = vpop.f32.mrf.mxu0 }
  0xc4   : > { %v746_v12 = vpop.f32.mrf.mxu1  ;;  %v658_v15 = vadd.f32 %v1679_v0, %v657_v11 }
  0xc6   : > { %696 = vmatmul.bf16.gmra.mxu0 %v356_v9  ;;  %v747_v16 = vadd.f32 %v746_v12, %v658_v15  ;;  %v367_v9 = vpack.c.bf16 %v283_v62, %v279_v61 }
  0xc7   : > { %785 = vmatmul.bf16.gmra.mxu1 %v357_v10 }
  0xc8   : > { %874 = vmatmul.bf16.gmra.mxu2 %v358_v13 }
  0xc9   : > { %963 = vmatmul.bf16.gmra.mxu3 %v359_v14 }
  0xcb   : > { %v835_v17 = vpop.f32.mrf.mxu2  ;;  %v659_v20 = vpop.f32.mrf.mxu0 }
  0xcc   : > { %v924_v18 = vpop.f32.mrf.mxu3  ;;  %v836_v19 = vadd.f32 %v835_v17, %v747_v16  ;;  %v748_v21 = vpop.f32.mrf.mxu1  ;;  %v660_v23 = vadd.f32 %v1679_v0, %v659_v20 }
  0xce   : > { %v925_v22 = vadd.f32 %v924_v18, %v836_v19  ;;  %v749_v33 = vadd.f32 %v748_v21, %v660_v23  ;;  %v284_v21 = vld [vmem:[%s1510_s26 + $0x2c0] sm:$0xff] }
  0xd0   : > { %v1004_v26 = vmax.f32 %v925_v22, 0.0  ;;  %v288_v22 = vld [vmem:[%s1510_s26 + $0x2e0] sm:$0xff] }
  0xd2   : > { %1036 = vst [vmem:[%s1696_s22] sm:$0xff] %v1004_v26  ;;  %v286_v26 = vld [vmem:[%s1510_s26 + $0x2d0] sm:$0xff] }
  0xd3   : > { %v837_v34 = vpop.f32.mrf.mxu2  ;;  %v662_v39 = vpop.f32.mrf.mxu0 }
  0xd4   : > { %v926_v35 = vpop.f32.mrf.mxu3  ;;  %v838_v38 = vadd.f32 %v837_v34, %v749_v33  ;;  %v751_v40 = vpop.f32.mrf.mxu1  ;;  %v663_v43 = vadd.f32 %v1679_v0, %v662_v39  ;;  %v368_v33 = vpack.c.bf16 %v288_v22, %v284_v21  ;;  %v369_v34 = vpack.c.bf16 %v289_v25, %v285_v24  ;;  %v301_v21 = vld [vmem:[%s1510_s26 + $0x348] sm:$0xff]  ;;  %v306_v24 = vld [vmem:[%s1510_s26 + $0x370] sm:$0xff]  ;;  %v303_v25 = vld [vmem:[%s1510_s26 + $0x358] sm:$0xff] }
  0xd5   : > { %v371_v39 = vpack.c.bf16 %v291_v29, %v287_v28  ;;  %v305_v22 = vld [vmem:[%s1510_s26 + $0x368] sm:$0xff] }
  0xd6   : > { %v927_v44 = vadd.f32 %v926_v35, %v838_v38  ;;  %701 = vmatmul.bf16.gmra.mxu0 %v360_v36  ;;  %v752_v46 = vadd.f32 %v751_v40, %v663_v43  ;;  %v370_v38 = vpack.c.bf16 %v290_v27, %v286_v26  ;;  %v307_v26 = vld [vmem:[%s1510_s26 + $0x378] sm:$0xff] }
  0xd7   : > { %790 = vmatmul.bf16.gmra.mxu1 %v361_v37 }
  0xd8   : > { %v1005_v45 = vmax.f32 %v927_v44, 0.0  ;;  %879 = vmatmul.bf16.gmra.mxu2 %v362_v41 }
  0xd9   : > { %968 = vmatmul.bf16.gmra.mxu3 %v363_v42 }
  0xda   : > { %1037 = vst [vmem:[%s1696_s22 + $0x8] sm:$0xff] %v1005_v45 }
  0xdb   : > { %v840_v47 = vpop.f32.mrf.mxu2  ;;  %v664_v50 = vpop.f32.mrf.mxu0 }
  0xdc   : > { %v929_v48 = vpop.f32.mrf.mxu3  ;;  %v841_v49 = vadd.f32 %v840_v47, %v752_v46  ;;  %v753_v51 = vpop.f32.mrf.mxu1  ;;  %v665_v53 = vadd.f32 %v1679_v0, %v664_v50 }
  0xde   : > { %v930_v52 = vadd.f32 %v929_v48, %v841_v49  ;;  %v754_v63 = vadd.f32 %v753_v51, %v665_v53  ;;  %v292_v51 = vld [vmem:[%s1510_s26 + $0x300] sm:$0xff] }
  0xe0   : > { %v1006_v56 = vmax.f32 %v930_v52, 0.0  ;;  %v296_v52 = vld [vmem:[%s1510_s26 + $0x320] sm:$0xff] }
  0xe2   : > { %1038 = vst [vmem:[%s1696_s22 + $0x10] sm:$0xff] %v1006_v56  ;;  %v294_v56 = vld [vmem:[%s1510_s26 + $0x310] sm:$0xff] }
  0xe3   : > { %v842_v1 = vpop.f32.mrf.mxu2  ;;  %v667_v6 = vpop.f32.mrf.mxu0 }
  0xe4   : > { %v931_v2 = vpop.f32.mrf.mxu3  ;;  %v843_v5 = vadd.f32 %v842_v1, %v754_v63  ;;  %v756_v7 = vpop.f32.mrf.mxu1  ;;  %v668_v10 = vadd.f32 %v1679_v0, %v667_v6  ;;  %v372_v63 = vpack.c.bf16 %v296_v52, %v292_v51  ;;  %v373_v1 = vpack.c.bf16 %v297_v55, %v293_v54  ;;  %v309_v51 = vld [vmem:[%s1510_s26 + $0x388] sm:$0xff]  ;;  %v314_v54 = vld [vmem:[%s1510_s26 + $0x3b0] sm:$0xff]  ;;  %v311_v55 = vld [vmem:[%s1510_s26 + $0x398] sm:$0xff] }
  0xe5   : > { %v375_v6 = vpack.c.bf16 %v299_v59, %v295_v58  ;;  %v313_v52 = vld [vmem:[%s1510_s26 + $0x3a8] sm:$0xff] }
  0xe6   : > { %v932_v11 = vadd.f32 %v931_v2, %v843_v5  ;;  %706 = vmatmul.bf16.gmra.mxu0 %v364_v3  ;;  %v757_v13 = vadd.f32 %v756_v7, %v668_v10  ;;  %v374_v5 = vpack.c.bf16 %v298_v57, %v294_v56  ;;  %v315_v56 = vld [vmem:[%s1510_s26 + $0x3b8] sm:$0xff] }
  0xe7   : > { %795 = vmatmul.bf16.gmra.mxu1 %v365_v4 }
  0xe8   : > { %v1007_v12 = vmax.f32 %v932_v11, 0.0  ;;  %884 = vmatmul.bf16.gmra.mxu2 %v366_v8 }
  0xe9   : > { %973 = vmatmul.bf16.gmra.mxu3 %v367_v9 }
  0xea   : > { %1039 = vst [vmem:[%s1696_s22 + $0x18] sm:$0xff] %v1007_v12 }
  0xeb   : > { %v845_v14 = vpop.f32.mrf.mxu2  ;;  %v669_v17 = vpop.f32.mrf.mxu0 }
  0xec   : > { %v934_v15 = vpop.f32.mrf.mxu3  ;;  %v846_v16 = vadd.f32 %v845_v14, %v757_v13  ;;  %v758_v18 = vpop.f32.mrf.mxu1  ;;  %v670_v20 = vadd.f32 %v1679_v0, %v669_v17 }
  0xee   : > { %v935_v19 = vadd.f32 %v934_v15, %v846_v16  ;;  %v759_v30 = vadd.f32 %v758_v18, %v670_v20  ;;  %v300_v18 = vld [vmem:[%s1510_s26 + $0x340] sm:$0xff] }
  0xf0   : > { %v1008_v23 = vmax.f32 %v935_v19, 0.0  ;;  %v304_v19 = vld [vmem:[%s1510_s26 + $0x360] sm:$0xff] }
  0xf2   : > { %1040 = vst [vmem:[%s1696_s22 + $0x20] sm:$0xff] %v1008_v23  ;;  %v302_v23 = vld [vmem:[%s1510_s26 + $0x350] sm:$0xff] }
  0xf3   : > { %v847_v31 = vpop.f32.mrf.mxu2  ;;  %v672_v36 = vpop.f32.mrf.mxu0 }
  0xf4   : > { %v936_v32 = vpop.f32.mrf.mxu3  ;;  %v848_v35 = vadd.f32 %v847_v31, %v759_v30  ;;  %v761_v37 = vpop.f32.mrf.mxu1  ;;  %v673_v40 = vadd.f32 %v1679_v0, %v672_v36  ;;  %v376_v30 = vpack.c.bf16 %v304_v19, %v300_v18  ;;  %v377_v31 = vpack.c.bf16 %v305_v22, %v301_v21  ;;  %v317_v18 = vld [vmem:[%s1510_s26 + $0x3c8] sm:$0xff]  ;;  %v322_v21 = vld [vmem:[%s1510_s26 + $0x3f0] sm:$0xff]  ;;  %v319_v22 = vld [vmem:[%s1510_s26 + $0x3d8] sm:$0xff] }
  0xf5   : > { %v379_v36 = vpack.c.bf16 %v307_v26, %v303_v25  ;;  %v321_v19 = vld [vmem:[%s1510_s26 + $0x3e8] sm:$0xff] }
  0xf6   : > { %v937_v41 = vadd.f32 %v936_v32, %v848_v35  ;;  %711 = vmatmul.bf16.gmra.mxu0 %v368_v33  ;;  %v762_v43 = vadd.f32 %v761_v37, %v673_v40  ;;  %v378_v35 = vpack.c.bf16 %v306_v24, %v302_v23  ;;  %v323_v23 = vld [vmem:[%s1510_s26 + $0x3f8] sm:$0xff] }
  0xf7   : > { %800 = vmatmul.bf16.gmra.mxu1 %v369_v34 }
  0xf8   : > { %v1009_v42 = vmax.f32 %v937_v41, 0.0  ;;  %889 = vmatmul.bf16.gmra.mxu2 %v370_v38 }
  0xf9   : > { %978 = vmatmul.bf16.gmra.mxu3 %v371_v39 }
  0xfa   : > { %1041 = vst [vmem:[%s1696_s22 + $0x28] sm:$0xff] %v1009_v42 }
  0xfb   : > { %v850_v44 = vpop.f32.mrf.mxu2  ;;  %v674_v47 = vpop.f32.mrf.mxu0 }
  0xfc   : > { %v939_v45 = vpop.f32.mrf.mxu3  ;;  %v851_v46 = vadd.f32 %v850_v44, %v762_v43  ;;  %v763_v48 = vpop.f32.mrf.mxu1  ;;  %v675_v50 = vadd.f32 %v1679_v0, %v674_v47 }
  0xfe   : > { %v940_v49 = vadd.f32 %v939_v45, %v851_v46  ;;  %v764_v60 = vadd.f32 %v763_v48, %v675_v50  ;;  %v308_v48 = vld [vmem:[%s1510_s26 + $0x380] sm:$0xff] }
 0x100   : > { %v1010_v53 = vmax.f32 %v940_v49, 0.0  ;;  %v312_v49 = vld [vmem:[%s1510_s26 + $0x3a0] sm:$0xff] }
 0x102   : > { %1042 = vst [vmem:[%s1696_s22 + $0x30] sm:$0xff] %v1010_v53  ;;  %v310_v53 = vld [vmem:[%s1510_s26 + $0x390] sm:$0xff] }
 0x103   : > { %v852_v61 = vpop.f32.mrf.mxu2  ;;  %v677_v3 = vpop.f32.mrf.mxu0 }
 0x104   : > { %v941_v62 = vpop.f32.mrf.mxu3  ;;  %v853_v2 = vadd.f32 %v852_v61, %v764_v60  ;;  %v766_v4 = vpop.f32.mrf.mxu1  ;;  %v678_v7 = vadd.f32 %v1679_v0, %v677_v3  ;;  %v380_v60 = vpack.c.bf16 %v312_v49, %v308_v48  ;;  %v381_v61 = vpack.c.bf16 %v313_v52, %v309_v51 }
 0x105   : > { %v383_v3 = vpack.c.bf16 %v315_v56, %v311_v55 }
 0x106   : > { %v942_v8 = vadd.f32 %v941_v62, %v853_v2  ;;  %716 = vmatmul.bf16.gmra.mxu0 %v372_v63  ;;  %v767_v10 = vadd.f32 %v766_v4, %v678_v7  ;;  %v382_v2 = vpack.c.bf16 %v314_v54, %v310_v53 }
 0x107   : > { %805 = vmatmul.bf16.gmra.mxu1 %v373_v1 }
 0x108   : > { %v1011_v9 = vmax.f32 %v942_v8, 0.0  ;;  %894 = vmatmul.bf16.gmra.mxu2 %v374_v5 }
 0x109   : > { %983 = vmatmul.bf16.gmra.mxu3 %v375_v6 }
 0x10a   : > { %1043 = vst [vmem:[%s1696_s22 + $0x38] sm:$0xff] %v1011_v9 }
 0x10b   : > { %v855_v11 = vpop.f32.mrf.mxu2  ;;  %v679_v14 = vpop.f32.mrf.mxu0 }
 0x10c   : > { %v944_v12 = vpop.f32.mrf.mxu3  ;;  %v856_v13 = vadd.f32 %v855_v11, %v767_v10  ;;  %v768_v15 = vpop.f32.mrf.mxu1  ;;  %v680_v17 = vadd.f32 %v1679_v0, %v679_v14 }
 0x10e   : > { %v945_v16 = vadd.f32 %v944_v12, %v856_v13  ;;  %v769_v27 = vadd.f32 %v768_v15, %v680_v17  ;;  %v316_v15 = vld [vmem:[%s1510_s26 + $0x3c0] sm:$0xff] }
 0x110   : > { %v1012_v20 = vmax.f32 %v945_v16, 0.0  ;;  %v320_v16 = vld [vmem:[%s1510_s26 + $0x3e0] sm:$0xff] }
 0x112   : > { %1044 = vst [vmem:[%s1696_s22 + $0x40] sm:$0xff] %v1012_v20  ;;  %v318_v20 = vld [vmem:[%s1510_s26 + $0x3d0] sm:$0xff] }
 0x113   : > { %v857_v28 = vpop.f32.mrf.mxu2  ;;  %v682_v33 = vpop.f32.mrf.mxu0 }
 0x114   : > { %v946_v29 = vpop.f32.mrf.mxu3  ;;  %v858_v32 = vadd.f32 %v857_v28, %v769_v27  ;;  %v771_v34 = vpop.f32.mrf.mxu1  ;;  %v683_v37 = vadd.f32 %v1679_v0, %v682_v33  ;;  %v384_v27 = vpack.c.bf16 %v320_v16, %v316_v15  ;;  %v385_v28 = vpack.c.bf16 %v321_v19, %v317_v18 }
 0x115   : > { %v387_v33 = vpack.c.bf16 %v323_v23, %v319_v22 }
 0x116   : > { %v947_v38 = vadd.f32 %v946_v29, %v858_v32  ;;  %721 = vmatmul.bf16.gmra.mxu0 %v376_v30  ;;  %v772_v40 = vadd.f32 %v771_v34, %v683_v37  ;;  %v386_v32 = vpack.c.bf16 %v322_v21, %v318_v20 }
 0x117   : > { %810 = vmatmul.bf16.gmra.mxu1 %v377_v31 }
 0x118   : > { %v1013_v39 = vmax.f32 %v947_v38, 0.0  ;;  %899 = vmatmul.bf16.gmra.mxu2 %v378_v35 }
 0x119   : > { %988 = vmatmul.bf16.gmra.mxu3 %v379_v36 }
 0x11a   : > { %1045 = vst [vmem:[%s1696_s22 + $0x48] sm:$0xff] %v1013_v39 }
 0x11b   : > { %v860_v41 = vpop.f32.mrf.mxu2  ;;  %v684_v44 = vpop.f32.mrf.mxu0 }
 0x11c   : > { %v949_v42 = vpop.f32.mrf.mxu3  ;;  %v861_v43 = vadd.f32 %v860_v41, %v772_v40  ;;  %v773_v45 = vpop.f32.mrf.mxu1  ;;  %v685_v47 = vadd.f32 %v1679_v0, %v684_v44 }
 0x11e   : > { %v950_v46 = vadd.f32 %v949_v42, %v861_v43  ;;  %v774_v57 = vadd.f32 %v773_v45, %v685_v47 }
 0x120   : > { %v1014_v50 = vmax.f32 %v950_v46, 0.0 }
 0x122   : > { %1046 = vst [vmem:[%s1696_s22 + $0x50] sm:$0xff] %v1014_v50 }
 0x123   : > { %v862_v58 = vpop.f32.mrf.mxu2  ;;  %v687_v63 = vpop.f32.mrf.mxu0 }
 0x124   : > { %v951_v59 = vpop.f32.mrf.mxu3  ;;  %v863_v62 = vadd.f32 %v862_v58, %v774_v57  ;;  %v776_v1 = vpop.f32.mrf.mxu1  ;;  %v688_v4 = vadd.f32 %v1679_v0, %v687_v63 }
 0x126   : > { %v952_v5 = vadd.f32 %v951_v59, %v863_v62  ;;  %726 = vmatmul.bf16.gmra.mxu0 %v380_v60  ;;  %v777_v7 = vadd.f32 %v776_v1, %v688_v4 }
 0x127   : > { %815 = vmatmul.bf16.gmra.mxu1 %v381_v61 }
 0x128   : > { %v1015_v6 = vmax.f32 %v952_v5, 0.0  ;;  %904 = vmatmul.bf16.gmra.mxu2 %v382_v2 }
 0x129   : > { %993 = vmatmul.bf16.gmra.mxu3 %v383_v3 }
 0x12a   : > { %1047 = vst [vmem:[%s1696_s22 + $0x58] sm:$0xff] %v1015_v6 }
 0x12b   : > { %v865_v8 = vpop.f32.mrf.mxu2  ;;  %v689_v11 = vpop.f32.mrf.mxu0 }
 0x12c   : > { %v954_v9 = vpop.f32.mrf.mxu3  ;;  %v866_v10 = vadd.f32 %v865_v8, %v777_v7  ;;  %v778_v12 = vpop.f32.mrf.mxu1  ;;  %v690_v14 = vadd.f32 %v1679_v0, %v689_v11 }
 0x12e   : > { %v955_v13 = vadd.f32 %v954_v9, %v866_v10  ;;  %v779_v24 = vadd.f32 %v778_v12, %v690_v14 }
 0x130   : > { %v1016_v17 = vmax.f32 %v955_v13, 0.0 }
 0x132   : > { %1048 = vst [vmem:[%s1696_s22 + $0x60] sm:$0xff] %v1016_v17 }
 0x133   : > { %v867_v25 = vpop.f32.mrf.mxu2  ;;  %v692_v30 = vpop.f32.mrf.mxu0 }
 0x134   : > { %v956_v26 = vpop.f32.mrf.mxu3  ;;  %v868_v29 = vadd.f32 %v867_v25, %v779_v24  ;;  %v781_v31 = vpop.f32.mrf.mxu1  ;;  %v693_v34 = vadd.f32 %v1679_v0, %v692_v30 }
 0x136   : > { %v957_v35 = vadd.f32 %v956_v26, %v868_v29  ;;  %731 = vmatmul.bf16.gmra.mxu0 %v384_v27  ;;  %v782_v37 = vadd.f32 %v781_v31, %v693_v34 }
 0x137   : > { %820 = vmatmul.bf16.gmra.mxu1 %v385_v28 }
 0x138   : > { %v1017_v36 = vmax.f32 %v957_v35, 0.0  ;;  %909 = vmatmul.bf16.gmra.mxu2 %v386_v32 }
 0x139   : > { %998 = vmatmul.bf16.gmra.mxu3 %v387_v33 }
 0x13a   : > { %1049 = vst [vmem:[%s1696_s22 + $0x68] sm:$0xff] %v1017_v36 }
 0x13b   : > { %v870_v38 = vpop.f32.mrf.mxu2  ;;  %v694_v41 = vpop.f32.mrf.mxu0 }
 0x13c   : > { %v959_v39 = vpop.f32.mrf.mxu3  ;;  %v871_v40 = vadd.f32 %v870_v38, %v782_v37  ;;  %v783_v42 = vpop.f32.mrf.mxu1  ;;  %v695_v44 = vadd.f32 %v1679_v0, %v694_v41 }
 0x13e   : > { %v960_v43 = vadd.f32 %v959_v39, %v871_v40  ;;  %v784_v46 = vadd.f32 %v783_v42, %v695_v44 }
 0x140   : > { %v1018_v45 = vmax.f32 %v960_v43, 0.0 }
 0x142   : > { %1050 = vst [vmem:[%s1696_s22 + $0x70] sm:$0xff] %v1018_v45 }
 0x143   : > { %v872_v47 = vpop.f32.mrf.mxu2  ;;  %v697_v50 = vpop.f32.mrf.mxu0 }
 0x144   : > { %v961_v48 = vpop.f32.mrf.mxu3  ;;  %v873_v49 = vadd.f32 %v872_v47, %v784_v46  ;;  %v786_v51 = vpop.f32.mrf.mxu1  ;;  %v698_v52 = vadd.f32 %v1679_v0, %v697_v50 }
 0x146   : > { %v962_v53 = vadd.f32 %v961_v48, %v873_v49  ;;  %v787_v55 = vadd.f32 %v786_v51, %v698_v52 }
 0x148   : > { %v1019_v54 = vmax.f32 %v962_v53, 0.0 }
 0x14a   : > { %1051 = vst [vmem:[%s1696_s22 + $0x78] sm:$0xff] %v1019_v54 }
 0x14b   : > { %v875_v56 = vpop.f32.mrf.mxu2  ;;  %v699_v59 = vpop.f32.mrf.mxu0 }
 0x14c   : > { %v964_v57 = vpop.f32.mrf.mxu3  ;;  %v876_v58 = vadd.f32 %v875_v56, %v787_v55  ;;  %v788_v60 = vpop.f32.mrf.mxu1  ;;  %v700_v62 = vadd.f32 %v1679_v0, %v699_v59 }
 0x14e   : > { %v965_v61 = vadd.f32 %v964_v57, %v876_v58  ;;  %v789_v1 = vadd.f32 %v788_v60, %v700_v62 }
 0x150   : > { %v1020_v63 = vmax.f32 %v965_v61, 0.0 }
 0x152   : > { %1052 = vst [vmem:[%s1696_s22 + $0x80] sm:$0xff] %v1020_v63 }
 0x153   : > { %v877_v2 = vpop.f32.mrf.mxu2  ;;  %v702_v5 = vpop.f32.mrf.mxu0 }
 0x154   : > { %v966_v3 = vpop.f32.mrf.mxu3  ;;  %v878_v4 = vadd.f32 %v877_v2, %v789_v1  ;;  %v791_v6 = vpop.f32.mrf.mxu1  ;;  %v703_v7 = vadd.f32 %v1679_v0, %v702_v5 }
 0x156   : > { %v967_v8 = vadd.f32 %v966_v3, %v878_v4  ;;  %v792_v10 = vadd.f32 %v791_v6, %v703_v7 }
 0x158   : > { %v1021_v9 = vmax.f32 %v967_v8, 0.0 }
 0x15a   : > { %1053 = vst [vmem:[%s1696_s22 + $0x88] sm:$0xff] %v1021_v9 }
 0x15b   : > { %v880_v11 = vpop.f32.mrf.mxu2  ;;  %v704_v14 = vpop.f32.mrf.mxu0 }
 0x15c   : > { %v969_v12 = vpop.f32.mrf.mxu3  ;;  %v881_v13 = vadd.f32 %v880_v11, %v792_v10  ;;  %v793_v15 = vpop.f32.mrf.mxu1  ;;  %v705_v17 = vadd.f32 %v1679_v0, %v704_v14 }
 0x15e   : > { %v970_v16 = vadd.f32 %v969_v12, %v881_v13  ;;  %v794_v19 = vadd.f32 %v793_v15, %v705_v17 }
 0x160   : > { %v1022_v18 = vmax.f32 %v970_v16, 0.0 }
 0x162   : > { %1054 = vst [vmem:[%s1696_s22 + $0x90] sm:$0xff] %v1022_v18 }
 0x163   : > { %v882_v20 = vpop.f32.mrf.mxu2  ;;  %v707_v23 = vpop.f32.mrf.mxu0 }
 0x164   : > { %v971_v21 = vpop.f32.mrf.mxu3  ;;  %v883_v22 = vadd.f32 %v882_v20, %v794_v19  ;;  %v796_v24 = vpop.f32.mrf.mxu1  ;;  %v708_v25 = vadd.f32 %v1679_v0, %v707_v23 }
 0x166   : > { %v972_v26 = vadd.f32 %v971_v21, %v883_v22  ;;  %v797_v28 = vadd.f32 %v796_v24, %v708_v25 }
 0x168   : > { %v1023_v27 = vmax.f32 %v972_v26, 0.0 }
 0x16a   : > { %1055 = vst [vmem:[%s1696_s22 + $0x98] sm:$0xff] %v1023_v27 }
 0x16b   : > { %v885_v29 = vpop.f32.mrf.mxu2  ;;  %v709_v32 = vpop.f32.mrf.mxu0 }
 0x16c   : > { %v974_v30 = vpop.f32.mrf.mxu3  ;;  %v886_v31 = vadd.f32 %v885_v29, %v797_v28  ;;  %v798_v33 = vpop.f32.mrf.mxu1  ;;  %v710_v35 = vadd.f32 %v1679_v0, %v709_v32 }
 0x16e   : > { %v975_v34 = vadd.f32 %v974_v30, %v886_v31  ;;  %v799_v37 = vadd.f32 %v798_v33, %v710_v35 }
 0x170   : > { %v1024_v36 = vmax.f32 %v975_v34, 0.0 }
 0x172   : > { %1056 = vst [vmem:[%s1696_s22 + $0xa0] sm:$0xff] %v1024_v36 }
 0x173   : > { %v887_v38 = vpop.f32.mrf.mxu2  ;;  %v712_v41 = vpop.f32.mrf.mxu0 }
 0x174   : > { %v976_v39 = vpop.f32.mrf.mxu3  ;;  %v888_v40 = vadd.f32 %v887_v38, %v799_v37  ;;  %v801_v42 = vpop.f32.mrf.mxu1  ;;  %v713_v43 = vadd.f32 %v1679_v0, %v712_v41 }
 0x176   : > { %v977_v44 = vadd.f32 %v976_v39, %v888_v40  ;;  %v802_v46 = vadd.f32 %v801_v42, %v713_v43 }
 0x178   : > { %v1025_v45 = vmax.f32 %v977_v44, 0.0 }
 0x17a   : > { %1057 = vst [vmem:[%s1696_s22 + $0xa8] sm:$0xff] %v1025_v45 }
 0x17b   : > { %v890_v47 = vpop.f32.mrf.mxu2  ;;  %v714_v50 = vpop.f32.mrf.mxu0 }
 0x17c   : > { %v979_v48 = vpop.f32.mrf.mxu3  ;;  %v891_v49 = vadd.f32 %v890_v47, %v802_v46  ;;  %v803_v51 = vpop.f32.mrf.mxu1  ;;  %v715_v53 = vadd.f32 %v1679_v0, %v714_v50 }
 0x17e   : > { %v980_v52 = vadd.f32 %v979_v48, %v891_v49  ;;  %v804_v55 = vadd.f32 %v803_v51, %v715_v53 }
 0x180   : > { %v1026_v54 = vmax.f32 %v980_v52, 0.0 }
 0x182   : > { %1058 = vst [vmem:[%s1696_s22 + $0xb0] sm:$0xff] %v1026_v54 }
 0x183   : > { %v892_v56 = vpop.f32.mrf.mxu2  ;;  %v717_v59 = vpop.f32.mrf.mxu0 }
 0x184   : > { %v981_v57 = vpop.f32.mrf.mxu3  ;;  %v893_v58 = vadd.f32 %v892_v56, %v804_v55  ;;  %v806_v60 = vpop.f32.mrf.mxu1  ;;  %v718_v61 = vadd.f32 %v1679_v0, %v717_v59 }
 0x186   : > { %v982_v62 = vadd.f32 %v981_v57, %v893_v58  ;;  %v807_v1 = vadd.f32 %v806_v60, %v718_v61 }
 0x188   : > { %v1027_v63 = vmax.f32 %v982_v62, 0.0 }
 0x18a   : > { %1059 = vst [vmem:[%s1696_s22 + $0xb8] sm:$0xff] %v1027_v63 }
 0x18b   : > { %v895_v2 = vpop.f32.mrf.mxu2  ;;  %v719_v5 = vpop.f32.mrf.mxu0 }
 0x18c   : > { %v984_v3 = vpop.f32.mrf.mxu3  ;;  %v896_v4 = vadd.f32 %v895_v2, %v807_v1  ;;  %v808_v6 = vpop.f32.mrf.mxu1  ;;  %v720_v8 = vadd.f32 %v1679_v0, %v719_v5 }
 0x18e   : > { %v985_v7 = vadd.f32 %v984_v3, %v896_v4  ;;  %v809_v10 = vadd.f32 %v808_v6, %v720_v8 }
 0x190   : > { %v1028_v9 = vmax.f32 %v985_v7, 0.0 }
 0x192   : > { %1060 = vst [vmem:[%s1696_s22 + $0xc0] sm:$0xff] %v1028_v9 }
 0x193   : > { %v897_v11 = vpop.f32.mrf.mxu2  ;;  %v722_v14 = vpop.f32.mrf.mxu0 }
 0x194   : > { %v986_v12 = vpop.f32.mrf.mxu3  ;;  %v898_v13 = vadd.f32 %v897_v11, %v809_v10  ;;  %v811_v15 = vpop.f32.mrf.mxu1  ;;  %v723_v16 = vadd.f32 %v1679_v0, %v722_v14 }
 0x196   : > { %v987_v17 = vadd.f32 %v986_v12, %v898_v13  ;;  %v812_v19 = vadd.f32 %v811_v15, %v723_v16 }
 0x198   : > { %v1029_v18 = vmax.f32 %v987_v17, 0.0 }
 0x19a   : > { %1061 = vst [vmem:[%s1696_s22 + $0xc8] sm:$0xff] %v1029_v18 }
 0x19b   : > { %v900_v20 = vpop.f32.mrf.mxu2  ;;  %v724_v23 = vpop.f32.mrf.mxu0 }
 0x19c   : > { %v989_v21 = vpop.f32.mrf.mxu3  ;;  %v901_v22 = vadd.f32 %v900_v20, %v812_v19  ;;  %v813_v24 = vpop.f32.mrf.mxu1  ;;  %v725_v26 = vadd.f32 %v1679_v0, %v724_v23 }
 0x19e   : > { %v990_v25 = vadd.f32 %v989_v21, %v901_v22  ;;  %v814_v28 = vadd.f32 %v813_v24, %v725_v26 }
 0x1a0   : > { %v1030_v27 = vmax.f32 %v990_v25, 0.0 }
 0x1a2   : > { %1062 = vst [vmem:[%s1696_s22 + $0xd0] sm:$0xff] %v1030_v27 }
 0x1a3   : > { %v902_v29 = vpop.f32.mrf.mxu2  ;;  %v727_v32 = vpop.f32.mrf.mxu0 }
 0x1a4   : > { %v991_v30 = vpop.f32.mrf.mxu3  ;;  %v903_v31 = vadd.f32 %v902_v29, %v814_v28  ;;  %v816_v33 = vpop.f32.mrf.mxu1  ;;  %v728_v34 = vadd.f32 %v1679_v0, %v727_v32 }
 0x1a6   : > { %v992_v35 = vadd.f32 %v991_v30, %v903_v31  ;;  %v817_v37 = vadd.f32 %v816_v33, %v728_v34 }
 0x1a8   : > { %v1031_v36 = vmax.f32 %v992_v35, 0.0 }
 0x1aa   : > { %1063 = vst [vmem:[%s1696_s22 + $0xd8] sm:$0xff] %v1031_v36 }
 0x1ab   : > { %v905_v38 = vpop.f32.mrf.mxu2  ;;  %v729_v41 = vpop.f32.mrf.mxu0 }
 0x1ac   : > { %v994_v39 = vpop.f32.mrf.mxu3  ;;  %v906_v40 = vadd.f32 %v905_v38, %v817_v37  ;;  %v818_v42 = vpop.f32.mrf.mxu1  ;;  %v730_v44 = vadd.f32 %v1679_v0, %v729_v41 }
 0x1ae   : > { %v995_v43 = vadd.f32 %v994_v39, %v906_v40  ;;  %v819_v46 = vadd.f32 %v818_v42, %v730_v44 }
 0x1b0   : > { %v1032_v45 = vmax.f32 %v995_v43, 0.0 }
 0x1b2   : > { %1064 = vst [vmem:[%s1696_s22 + $0xe0] sm:$0xff] %v1032_v45 }
 0x1b3   : > { %v907_v47 = vpop.f32.mrf.mxu2  ;;  %v732_v50 = vpop.f32.mrf.mxu0 }
 0x1b4   : > { %v996_v48 = vpop.f32.mrf.mxu3  ;;  %v908_v49 = vadd.f32 %v907_v47, %v819_v46  ;;  %v733_v51 = vadd.f32 %v1679_v0, %v732_v50  ;;  %v821_v53 = vpop.f32.mrf.mxu1 }
 0x1b6   : > { %v997_v52 = vadd.f32 %v996_v48, %v908_v49  ;;  %v822_v55 = vadd.f32 %v821_v53, %v733_v51 }
 0x1b8   : > { %v1033_v54 = vmax.f32 %v997_v52, 0.0 }
 0x1ba   : > { %1065 = vst [vmem:[%s1696_s22 + $0xe8] sm:$0xff] %v1033_v54 }
 0x1bb   : > { %v910_v56 = vpop.f32.mrf.mxu2  ;;  %v734_v59 = vpop.f32.mrf.mxu0 }
 0x1bc   : > { %v999_v57 = vpop.f32.mrf.mxu3  ;;  %v911_v58 = vadd.f32 %v910_v56, %v822_v55  ;;  %v735_v61 = vadd.f32 %v1679_v0, %v734_v59  ;;  %v823_v63 = vpop.f32.mrf.mxu1 }
 0x1be   : > { %v1000_v60 = vadd.f32 %v999_v57, %v911_v58  ;;  %v824_v1 = vadd.f32 %v823_v63, %v735_v61 }
 0x1c0   : > { %v1034_v62 = vmax.f32 %v1000_v60, 0.0 }
 0x1c2   : > { %1066 = vst [vmem:[%s1696_s22 + $0xf0] sm:$0xff] %v1034_v62 }
 0x1c3   : > { %v912_v2 = vpop.f32.mrf.mxu2 }
 0x1c4   : > { %v913_v3 = vadd.f32 %v912_v2, %v824_v1  ;;  %v1001_v4 = vpop.f32.mrf.mxu3 }
 0x1c6   : > { %v1002_v5 = vadd.f32 %v1001_v4, %v913_v3 }
 0x1c8   : > { %v1035_v6 = vmax.f32 %v1002_v5, 0.0 }
 0x1ca   : > { %1067 = vst [vmem:[%s1696_s22 + $0xf8] sm:$0xff] %v1035_v6 }
 0x1cb PF: > { %p13_p7 = scmp.ge.s32.totalorder %s1461_s17, 4   ;;  %s1836_s12 = smov %s1409_s13 }
 0x1cc   : > { %s1837_s13 = smov %s1413_s14  ;;  %s1838_s14 = smov %s1471_s20 }
 0x1cd   : > { %s1839_s15 = smov %s1461_s17  ;;  %15 = sbr.rel (!%p13_p7) target bundleno = 3 (0x3), region = 72 }
 0x1d2   :  { %1090 = vsyncpa [#allocation3], 1 }
 0x1d3   :  { %1092 = vsyncpa [#allocation3 + $0x1], 1 }

</bundles_post_ra>
